<compile_context>
chip_gen: v7x
topology: tpu7x:2x2x1
jax: 0.10.0
libtpu: 0.0.40
codegen_flags: <defaults>
</compile_context>

<pallas_src>
import functools

import jax
import jax.numpy as jnp
from jax import lax
from jax.experimental import pallas as pl
from jax.experimental.pallas import tpu as pltpu


def _mixed_loss_partials_kernel(x_ref, t_ref, o_ref, *, n_rows):
    # x_ref: (TN, C) logits (native dtype), t_ref: (TN, 1) int32 targets,
    # o_ref: (1, 8, 128) f32 partial sums [mae_num, mse_num, rce_num, 0, ...] on row 0.
    tn, c = x_ref.shape
    x = x_ref[...].astype(jnp.float32)                         # cast in-kernel
    t = t_ref[...]                                             # (TN, 1) int32

    # Numerically stable softmax over the class axis; the row divide goes to the
    # EUP via approx reciprocal + one Newton-Raphson refinement on (TN, 1).
    m = jnp.max(x, axis=1, keepdims=True)                      # (TN, 1)
    e = jnp.exp(x - m)                                         # (TN, C)
    denom = jnp.sum(e, axis=1, keepdims=True)                  # (TN, 1), >= 1
    inv = pl.reciprocal(denom, approx=True)
    inv = inv * (2.0 - denom * inv)                            # Newton step (cheap)
    p = e * inv                                                # (TN, C)

    # One-hot via iota compare (no gather).
    col = lax.broadcasted_iota(jnp.int32, (tn, c), 1)
    is_t = col == t

    p_t = jnp.sum(jnp.where(is_t, p, 0.0), axis=1, keepdims=True)       # (TN, 1)
    sum_p2 = jnp.sum(p * p, axis=1, keepdims=True)                      # (TN, 1)
    p_cl_sum = jnp.sum(jnp.maximum(p, 1e-7), axis=1, keepdims=True)     # (TN, 1)

    row_mae = 2.0 * (1.0 - p_t)                                 # sum_j |p - oh|
    row_mse = sum_p2 - 2.0 * p_t + 1.0                          # sum_j (p - oh)^2
    row_rce = p_cl_sum - jnp.maximum(p_t, 1e-7)                 # * (-log 1e-4) later

    # Mask rows beyond the true batch size (partial last block): use select so
    # garbage (possibly NaN) padded rows contribute exactly 0.
    grow = pl.program_id(0) * tn + lax.broadcasted_iota(jnp.int32, (tn, 1), 0)
    valid = grow < n_rows
    zero = jnp.zeros_like(row_mae)
    mae_s = jnp.sum(jnp.where(valid, row_mae, zero))
    mse_s = jnp.sum(jnp.where(valid, row_mse, zero))
    rce_s = jnp.sum(jnp.where(valid, row_rce, zero))

    # Pack the three partial sums into lanes 0..2 of sublane 0 of this block's
    # (1, 8, 128) output tile; everything else is zero so the wrapper can just sum.
    sub = lax.broadcasted_iota(jnp.int32, (1, 8, 128), 1)
    lane = lax.broadcasted_iota(jnp.int32, (1, 8, 128), 2)
    vals = jnp.where(lane == 0, mae_s,
           jnp.where(lane == 1, mse_s,
           jnp.where(lane == 2, rce_s, 0.0)))
    o_ref[...] = jnp.where(sub == 0, vals, 0.0)


def _choose_tn(n, c, itemsize):
    # ~2 MiB logits block (pipeline double-buffers -> ~4 MiB/input), well inside
    # the 32 MiB vmem_limit_bytes requested below (also fits v5e's budget).
    target_bytes = 2 * 1024 * 1024
    tn = max(8, target_bytes // max(1, c * itemsize))
    if tn >= n:
        return n
    return max(8, (tn // 8) * 8)


def mixed_loss_partial_sums(pred, labels, *, tn=None):
    """Returns (mae_numerator, mse_numerator, rce_numerator) as f32 scalars."""
    n, c = pred.shape
    itemsize = jnp.dtype(pred.dtype).itemsize
    if tn is None:
        tn = _choose_tn(n, c, itemsize)
    tn = int(min(tn, n))
    if tn < n:
        tn = max(8, (tn // 8) * 8)
    grid = pl.cdiv(n, tn)

    tgt = labels.astype(jnp.int32).reshape(n, 1)
    kernel = functools.partial(_mixed_loss_partials_kernel, n_rows=n)

    cost = pl.CostEstimate(
        flops=8 * n * c,
        transcendentals=n * c,
        bytes_accessed=n * c * itemsize + n * 4 + grid * 8 * 128 * 4,
    )

    partials = pl.pallas_call(
        kernel,
        out_shape=jax.ShapeDtypeStruct((grid, 8, 128), jnp.float32),
        grid=(grid,),
        in_specs=[
            pl.BlockSpec((tn, c), lambda i: (i, 0)),   # logits, native dtype
            pl.BlockSpec((tn, 1), lambda i: (i, 0)),   # targets
        ],
        out_specs=pl.BlockSpec((1, 8, 128), lambda i: (i, 0, 0)),
        compiler_params=pltpu.CompilerParams(
            dimension_semantics=("parallel",),         # independent partial sums
            vmem_limit_bytes=32 * 1024 * 1024,
        ),
        cost_estimate=cost,
    )(pred, tgt)

    sums = jnp.sum(partials, axis=(0, 1))              # (128,)
    return sums[0], sums[1], sums[2]


_ACTIVATIONS = {
    "Sigmoid": jax.nn.sigmoid,
    "ReLU": jax.nn.relu,
    "Softplus": jax.nn.softplus,
    "Tanh": jnp.tanh,
    "Identity": lambda x: x,
}


def mixed_loss_ce(pred, labels, alpha_ce, alpha_rce, alpha_mae, alpha_mse,
                  activation_type="Sigmoid", tn=None):
    """pred: (N, C) logits (any float dtype); labels: (N,) int. Returns scalar f32."""
    n, c = pred.shape
    act = _ACTIVATIONS[activation_type]

    mae_num, mse_num, rce_num = mixed_loss_partial_sums(pred, labels, tn=tn)
    n_el = jnp.float32(n * c)
    mae = mae_num / n_el
    mse = mse_num / n_el
    rce = (-jnp.log(jnp.float32(1e-4))) * rce_num / jnp.float32(n)

    w_ce = act(jnp.asarray(alpha_ce, jnp.float32))   # computed but unused, as in the PyTorch forward
    w_rce = act(jnp.asarray(alpha_rce, jnp.float32))
    w_mae = act(jnp.asarray(alpha_mae, jnp.float32))
    w_mse = act(jnp.asarray(alpha_mse, jnp.float32))
    del w_ce

    return w_rce * rce + w_mae * mae + w_mse * mse


if __name__ == "__main__":
    key = jax.random.PRNGKey(0)
    k1, k2 = jax.random.split(key)

    # Small classification shapes; N deliberately not a multiple of tn so the
    # grid (4 blocks of 16 rows) exercises the masked partial last block.
    N, C = 50, 10
    pred = jax.random.normal(k1, (N, C), dtype=jnp.float32) * 3.0
    labels = jax.random.randint(k2, (N,), 0, C, dtype=jnp.int32)

    alpha_ce, alpha_rce, alpha_mae, alpha_mse = 0.5, 1.0, 2.0, 1.5
    activation_type = "Sigmoid"

    loss = mixed_loss_ce(pred, labels, alpha_ce, alpha_rce, alpha_mae, alpha_mse,
                         activation_type=activation_type, tn=16)
    loss = jax.block_until_ready(loss)

    # Pure-JAX reference of the PyTorch forward.
    act = _ACTIVATIONS[activation_type]
    x = pred.astype(jnp.float32)
    p_ref = jax.nn.softmax(x, axis=1)
    oh_ref = jax.nn.one_hot(labels, C, dtype=jnp.float32)
    mae_ref = jnp.mean(jnp.abs(p_ref - oh_ref))
    mse_ref = jnp.mean((p_ref - oh_ref) ** 2)
    p_cl = jnp.clip(p_ref, 1e-7, 1.0)
    oh_cl = jnp.clip(oh_ref, 1e-4, 1.0)
    rce_ref = jnp.mean(-jnp.sum(p_cl * jnp.log(oh_cl), axis=1))
    ref = (act(jnp.float32(alpha_rce)) * rce_ref
           + act(jnp.float32(alpha_mae)) * mae_ref
           + act(jnp.float32(alpha_mse)) * mse_ref)

    assert jnp.allclose(loss, ref, atol=1e-4, rtol=1e-4), (loss, ref)
    print("KERNEL_OK")
</pallas_src>

<mosaic_0001>
module attributes {stable_mosaic.version = 11 : i64} {
  func.func @_mixed_loss_partials_kernel(%arg0: i32, %arg1: memref<16x10xf32, #tpu.memory_space<vmem>>, %arg2: memref<16x1xi32, #tpu.memory_space<vmem>>, %arg3: memref<1x8x128xf32, #tpu.memory_space<vmem>>) attributes {dimension_semantics = [#tpu.dimension_semantics<parallel>], iteration_bounds = array<i64: 4>, scalar_prefetch = 0 : i64, scratch_operands = 0 : i64, tpu.core_type = #tpu.core_type<tc>, window_params = [{transform_indices = @transform_0, window_bounds = array<i64: 16, 10>}, {transform_indices = @transform_1, window_bounds = array<i64: 16, 1>}, {transform_indices = @transform_2, window_bounds = array<i64: 1, 8, 128>}]} {
    %c0 = arith.constant 0 : index
    %c0_0 = arith.constant 0 : index
    %0 = vector.load %arg1[%c0, %c0_0] : memref<16x10xf32, #tpu.memory_space<vmem>>, vector<16x10xf32>
    %c0_1 = arith.constant 0 : index
    %c0_2 = arith.constant 0 : index
    %1 = vector.load %arg2[%c0_1, %c0_2] : memref<16x1xi32, #tpu.memory_space<vmem>>, vector<16x1xi32>
    %cst = arith.constant dense<0xFF800000> : vector<16xf32>
    %2 = vector.multi_reduction <maximumf>, %0, %cst [1] : vector<16x10xf32> to vector<16xf32>
    %3 = vector.shape_cast %2 : vector<16xf32> to vector<16x1xf32>
    %4 = vector.broadcast %3 : vector<16x1xf32> to vector<16x10xf32>
    %5 = arith.subf %0, %4 : vector<16x10xf32>
    %6 = math.exp %5 : vector<16x10xf32>
    %cst_3 = arith.constant dense<0.000000e+00> : vector<16xf32>
    %7 = vector.multi_reduction <add>, %6, %cst_3 [1] : vector<16x10xf32> to vector<16xf32>
    %8 = vector.shape_cast %7 : vector<16xf32> to vector<16x1xf32>
    %9 = tpu.reciprocal %8 {approx = true} : vector<16x1xf32> -> vector<16x1xf32>
    %10 = arith.mulf %8, %9 : vector<16x1xf32>
    %cst_4 = arith.constant 2.000000e+00 : f32
    %11 = vector.broadcast %cst_4 : f32 to vector<16x1xf32>
    %12 = arith.subf %11, %10 : vector<16x1xf32>
    %13 = arith.mulf %9, %12 : vector<16x1xf32>
    %14 = vector.broadcast %13 : vector<16x1xf32> to vector<16x10xf32>
    %15 = arith.mulf %6, %14 : vector<16x10xf32>
    %16 = tpu.iota {dimensions = array<i32: 1>} : vector<16x10xi32>
    %17 = vector.broadcast %1 : vector<16x1xi32> to vector<16x10xi32>
    %18 = arith.cmpi eq, %16, %17 : vector<16x10xi32>
    %cst_5 = arith.constant 0.000000e+00 : f32
    %19 = vector.broadcast %cst_5 : f32 to vector<16x10xf32>
    %20 = arith.select %18, %15, %19 : vector<16x10xi1>, vector<16x10xf32>
    %cst_6 = arith.constant dense<0.000000e+00> : vector<16xf32>
    %21 = vector.multi_reduction <add>, %20, %cst_6 [1] : vector<16x10xf32> to vector<16xf32>
    %22 = vector.shape_cast %21 : vector<16xf32> to vector<16x1xf32>
    %23 = arith.mulf %15, %15 : vector<16x10xf32>
    %cst_7 = arith.constant dense<0.000000e+00> : vector<16xf32>
    %24 = vector.multi_reduction <add>, %23, %cst_7 [1] : vector<16x10xf32> to vector<16xf32>
    %25 = vector.shape_cast %24 : vector<16xf32> to vector<16x1xf32>
    %cst_8 = arith.constant 1.000000e-07 : f32
    %26 = vector.broadcast %cst_8 : f32 to vector<16x10xf32>
    %27 = arith.maximumf %15, %26 : vector<16x10xf32>
    %cst_9 = arith.constant dense<0.000000e+00> : vector<16xf32>
    %28 = vector.multi_reduction <add>, %27, %cst_9 [1] : vector<16x10xf32> to vector<16xf32>
    %29 = vector.shape_cast %28 : vector<16xf32> to vector<16x1xf32>
    %cst_10 = arith.constant 1.000000e+00 : f32
    %30 = vector.broadcast %cst_10 : f32 to vector<16x1xf32>
    %31 = arith.subf %30, %22 : vector<16x1xf32>
    %cst_11 = arith.constant 2.000000e+00 : f32
    %32 = vector.broadcast %cst_11 : f32 to vector<16x1xf32>
    %33 = arith.mulf %32, %31 : vector<16x1xf32>
    %cst_12 = arith.constant 2.000000e+00 : f32
    %34 = vector.broadcast %cst_12 : f32 to vector<16x1xf32>
    %35 = arith.mulf %34, %22 : vector<16x1xf32>
    %36 = arith.subf %25, %35 : vector<16x1xf32>
    %cst_13 = arith.constant 1.000000e+00 : f32
    %37 = vector.broadcast %cst_13 : f32 to vector<16x1xf32>
    %38 = arith.addf %36, %37 : vector<16x1xf32>
    %cst_14 = arith.constant 1.000000e-07 : f32
    %39 = vector.broadcast %cst_14 : f32 to vector<16x1xf32>
    %40 = arith.maximumf %22, %39 : vector<16x1xf32>
    %41 = arith.subf %29, %40 : vector<16x1xf32>
    %c16_i32 = arith.constant 16 : i32
    %42 = arith.muli %arg0, %c16_i32 : i32
    %43 = tpu.iota {dimensions = array<i32: 0>} : vector<16x1xi32>
    %44 = vector.broadcast %42 : i32 to vector<16x1xi32>
    %45 = arith.addi %44, %43 : vector<16x1xi32>
    %c50_i32 = arith.constant 50 : i32
    %46 = vector.broadcast %c50_i32 : i32 to vector<16x1xi32>
    %47 = arith.cmpi slt, %45, %46 : vector<16x1xi32>
    %cst_15 = arith.constant 0.000000e+00 : f32
    %48 = vector.broadcast %cst_15 : f32 to vector<16x1xf32>
    %49 = arith.select %47, %33, %48 : vector<16x1xi1>, vector<16x1xf32>
    %50 = vector.shape_cast %49 : vector<16x1xf32> to vector<1x16x1xf32>
    %cst_16 = arith.constant dense<0.000000e+00> : vector<1xf32>
    %51 = vector.multi_reduction <add>, %50, %cst_16 [1, 2] : vector<1x16x1xf32> to vector<1xf32>
    %52 = vector.shape_cast %51 : vector<1xf32> to vector<1x1x1xf32>
    %53 = vector.extract %52[0, 0, 0] : f32 from vector<1x1x1xf32>
    %54 = arith.select %47, %38, %48 : vector<16x1xi1>, vector<16x1xf32>
    %55 = vector.shape_cast %54 : vector<16x1xf32> to vector<1x16x1xf32>
    %cst_17 = arith.constant dense<0.000000e+00> : vector<1xf32>
    %56 = vector.multi_reduction <add>, %55, %cst_17 [1, 2] : vector<1x16x1xf32> to vector<1xf32>
    %57 = vector.shape_cast %56 : vector<1xf32> to vector<1x1x1xf32>
    %58 = vector.extract %57[0, 0, 0] : f32 from vector<1x1x1xf32>
    %59 = arith.select %47, %41, %48 : vector<16x1xi1>, vector<16x1xf32>
    %60 = vector.shape_cast %59 : vector<16x1xf32> to vector<1x16x1xf32>
    %cst_18 = arith.constant dense<0.000000e+00> : vector<1xf32>
    %61 = vector.multi_reduction <add>, %60, %cst_18 [1, 2] : vector<1x16x1xf32> to vector<1xf32>
    %62 = vector.shape_cast %61 : vector<1xf32> to vector<1x1x1xf32>
    %63 = vector.extract %62[0, 0, 0] : f32 from vector<1x1x1xf32>
    %64 = tpu.iota {dimensions = array<i32: 1>} : vector<1x8x128xi32>
    %65 = tpu.iota {dimensions = array<i32: 2>} : vector<1x8x128xi32>
    %c0_i32 = arith.constant 0 : i32
    %66 = vector.broadcast %c0_i32 : i32 to vector<1x8x128xi32>
    %67 = arith.cmpi eq, %65, %66 : vector<1x8x128xi32>
    %c1_i32 = arith.constant 1 : i32
    %68 = vector.broadcast %c1_i32 : i32 to vector<1x8x128xi32>
    %69 = arith.cmpi eq, %65, %68 : vector<1x8x128xi32>
    %c2_i32 = arith.constant 2 : i32
    %70 = vector.broadcast %c2_i32 : i32 to vector<1x8x128xi32>
    %71 = arith.cmpi eq, %65, %70 : vector<1x8x128xi32>
    %cst_19 = arith.constant 0.000000e+00 : f32
    %72 = vector.broadcast %63 : f32 to vector<1x8x128xf32>
    %73 = vector.broadcast %cst_19 : f32 to vector<1x8x128xf32>
    %74 = arith.select %71, %72, %73 : vector<1x8x128xi1>, vector<1x8x128xf32>
    %75 = vector.broadcast %58 : f32 to vector<1x8x128xf32>
    %76 = arith.select %69, %75, %74 : vector<1x8x128xi1>, vector<1x8x128xf32>
    %77 = vector.broadcast %53 : f32 to vector<1x8x128xf32>
    %78 = arith.select %67, %77, %76 : vector<1x8x128xi1>, vector<1x8x128xf32>
    %c0_i32_20 = arith.constant 0 : i32
    %79 = vector.broadcast %c0_i32_20 : i32 to vector<1x8x128xi32>
    %80 = arith.cmpi eq, %64, %79 : vector<1x8x128xi32>
    %cst_21 = arith.constant 0.000000e+00 : f32
    %81 = vector.broadcast %cst_21 : f32 to vector<1x8x128xf32>
    %82 = arith.select %80, %78, %81 : vector<1x8x128xi1>, vector<1x8x128xf32>
    %c0_22 = arith.constant 0 : index
    %c0_23 = arith.constant 0 : index
    %c0_24 = arith.constant 0 : index
    %83 = vector.load %arg3[%c0_22, %c0_23, %c0_24] : memref<1x8x128xf32, #tpu.memory_space<vmem>>, vector<1x8x128xf32>
    tpu.vector_store %arg3[%c0_22, %c0_23, %c0_24], %82 {strides = array<i32>} : memref<1x8x128xf32, #tpu.memory_space<vmem>>, vector<1x8x128xf32>,
    return
  }
  func.func @transform_0(%arg0: i32) -> (i32, i32) {
    %c0_i32 = arith.constant 0 : i32
    %c0_i32_0 = arith.constant 0 : i32
    return %arg0, %c0_i32 : i32, i32
  }
  func.func @transform_1(%arg0: i32) -> (i32, i32) {
    %c0_i32 = arith.constant 0 : i32
    %c0_i32_0 = arith.constant 0 : i32
    return %arg0, %c0_i32 : i32, i32
  }
  func.func @transform_2(%arg0: i32) -> (i32, i32, i32) {
    %c0_i32 = arith.constant 0 : i32
    %c0_i32_0 = arith.constant 0 : i32
    %c0_i32_1 = arith.constant 0 : i32
    return %arg0, %c0_i32, %c0_i32_0 : i32, i32, i32
  }
}

</mosaic_0001>

<bundles_post_ra>
// kernel: tpu_custom_call.1
= control target key start
LH: loop header
LB: loop body
LE: loop exit
PB: predicated region body
PF: predicated region fallthrough
CT: control target
= control target key end

     0   :  { %7 = vsyncpa [#allocation3], 0  ;;  %s724_s0 = inlined_call_operand.vmem [shape: f32[50,10], index: 0, kind: input, shape index: {}]   ;;  %s725_s1 = inlined_call_operand.vmem [shape: s32[50,1], index: 1, kind: input, shape index: {}]   ;;  %s726_s2 = inlined_call_operand.hbm [shape: f32[4,8,128], index: 2, kind: output, shape index: {}]  }
   0x1   :  { %9 = vsyncpa [#allocation3 + $0x1], 0  ;;  %s587_s9 = smov 0   ;;  %s589_s10 = smov 0  }
   0x2   :  { %s591_s11 = smov 0   ;;  %s593_s12 = smov 0  }
   0x3 LB: > { %s608_s13 = sadd.s32 4294967295, %s568_s12   ;;  %s436_s14 = sadd.s32 4294967294, %s568_s12   ;;  %s568_s12 = sphi %s593_s12, %s732_s12   ;;  %s564_s11 = sphi %s591_s11, %s731_s11   ;;  %s560_s10 = sphi %s589_s10, %s730_s10   ;;  %s556_s9 = sphi %s587_s9, %s729_s9  }
   0x4   : > { %s612_s15 = sadd.s32 1, %s568_s12   ;;  %s74_s16 = sadd.s32 1, %s564_s11 }
   0x5   : > { %s71_s17 = ssub.s32 %s568_s12, %s612_s15  ;;  %p84_p0 = scmp.ne.s32.totalorder %s564_s11, %s560_s10 }
   0x6   : > { %p72_p1 = scmp.eq.s32.totalorder %s71_s17, 0  ;;  %p85_p2 = scmp.eq.s32.totalorder %s608_s13, 3 }
   0x7   : > { %p90_p3 = scmp.ne.s32.totalorder %s560_s10, %s556_s9  ;;  %p91_p4 = scmp.eq.s32.totalorder %s436_s14, 3 }
   0x8   : > { %s623_s18 = scalar_select %p72_p1, %s564_s11, %s74_s16  }
   0x9   : > { %p625_p5 = por %p85_p2, %p84_p0  ;;  %p629_p6 = por %p91_p4, %p90_p3 }
   0xa   : > { %p439_p7 = scmp.ge.s32.totalorder %s568_s12, 1  ;;  %p143_p8 = scmp.lt.s32.totalorder %s568_s12, 5 }
   0xc   : > { %p144_p9 = pnand %p439_p7, %p143_p8 }
   0xd   : > { %s441_s21 = sshll.u32 (!%p144_p9), %s608_s13, 1  ;;  %vm210_vm0 = vcmask (!%p144_p9), 80896   ;;  %v570_v4 = vmov (!%p144_p9), 0   ;;  %v239_v19 = vlaneseq (!%p144_p9)  ;;  %s445_s29 = sshll.u32 (!%p144_p9), %s608_s13, 4  ;;  %vm298_vm5 = vcmask (!%p144_p9), 7168  }
   0xe   : > { %147 = sbr.rel (%p144_p9) target bundleno = 734 (0x2de), region = 28  ;;  %p183_p10 = scmp.lt.s32.totalorder (!%p144_p9), %s441_s21, 6  ;;  %496 = vset.pattern.permute.xlu0 (!%p144_p9), %v570_v4  ;;  %497 = vset.pattern.permute.xlu1 (!%p144_p9), %v570_v4  ;;  %v291_v46 = vstv (!%p144_p9), %s445_s29 }
   0xf   : > { %v646_v22 = vand.u32 (!%p144_p9), 127, %v239_v19  ;;  %v657_v45 = vshrl.u32 (!%p144_p9), %v239_v19, 7  ;;  %s175_s30 = sand.u32 (!%p144_p9), 1, %s560_s10   ;;  %s447_s7 = sshll.u32 (!%p144_p9), %s608_s13, 7 }
  0x10   : > { %s440_s3 = sshll.u32 (!%p144_p9), %s175_s30, 3  ;;  %s352_s13 = scalar_lea.sflag (!%p144_p9), [#allocation3], %s175_s30 }
  0x11   : > { %v290_v47 = vadd.s32 (!%p144_p9), 8, %v657_v45  ;;  %v292_v49 = vadd.s32 (!%p144_p9), %v291_v46, %v657_v45  ;;  %vm341_vm6 = vcmp.eq.s32.totalorder (!%p144_p9), %v646_v22, 2  ;;  %vm340_vm7 = vcmp.eq.s32.totalorder (!%p144_p9), %v646_v22, 1  ;;  %s177_s8 = scalar_lea.vmem (!%p144_p9), [#allocation2], %s440_s3  ;;  %s571_s23 = smov (!%p144_p9), [#allocation2]  }
  0x12   : > { %vm339_vm8 = vcmp.eq.s32.totalorder (!%p144_p9), %v646_v22, 0  ;;  %s365_s14 = sshll.u32 (!%p144_p9), %s177_s8, 4  ;;  %vm348_vm9 = vcmp.eq.s32.totalorder (!%p144_p9), %v657_v45, 0  ;;  %s510_s24 = sshll.u32 (!%p144_p9), %s571_s23, 4  ;;  %s684_s14 = int_to_ptr.vmem [resolvable:$true] %s365_s14  ;;  %s511_s24 = int_to_ptr.vmem [resolvable:$false] %s510_s24 }
  0x13   : > { %v293_v51 = vadd.s32 (!%p144_p9), %v291_v46, %v290_v47  ;;  %vm294_vm3 = vcmp.lt.s32.totalorder (!%p144_p9), %v292_v49, 50  ;;  %p513_p0 = scmp.lt.s32.totalorder (!%p144_p9), %s684_s14, %s511_s24 }
  0x15   : > { %s734_s21 = smov (!%p183_p10, %s441_s21), 6  ;;  %vm295_vm4 = vcmp.lt.s32.totalorder %v293_v51, 50 }
  0x16   : > { %s442_s22 = sshll.u32 %s734_s21, 3  ;;  %s682_s21 = scalar_lea.hbm %s726_s2, %s447_s7 }
  0x17   : > { %s186_s25 = scalar_lea.vmem %s724_s0, %s442_s22  ;;  %s200_s28 = scalar_lea.vmem %s725_s1, %s442_s22 }
  0x18   : > { %v206_v0 = vld [vmem:[%s186_s25] sm:$0xff]  ;;  %v207_v1 = vld [vmem:[%s186_s25 + $0x8] sm:$0xff]  ;;  %s506_s22 = scalar_lea.vmem %s684_s14, 128  ;;  %s512_s25 = scalar_lea.vmem %s511_s24, 256 }
  0x19   : > { %v211_v2 = vsel %vm210_vm0, %v206_v0, -inf  ;;  %v214_v3 = vsel %vm210_vm0, %v207_v1, -inf  ;;  %v208_v5 = vld [vmem:[%s200_s28] sm:$0xff]  ;;  %v209_v16 = vld [vmem:[%s200_s28 + $0x8] sm:$0xff]  ;;  %p507_p11 = scmp.ne.s32.totalorder %s684_s14, %s506_s22  ;;  %p514_p1 = scmp.lt.s32.totalorder %s512_s25, %s506_s22 }
  0x1a   : > { %212 = vmax.xlane.f32.xlu0 %v211_v2 }
  0x1b   : > { %p508_p12 = pnand %p507_p11, %p625_p5  ;;  %p515_p2 = por %p514_p1, %p513_p0 }
  0x1d   : > { %p509_p13 = pneg %p508_p12 }
  0x1e   : > { %215 = vmax.xlane.f32.xlu0 %v214_v3 }
  0x1f   : > { %p516_p3 = pnand %p515_p2, %p509_p13 }
  0x34   : > { %242 = vperm.xlu0 %496, %v208_v5  }
  0xa7   : > { %v213_v6 = vpop.xlane.xlu0 %212 }
  0xa8   : > { %v217_v7 = vsub.f32 %v206_v0, %v213_v6 }
  0xaa   : > { %v219_v8 = vmul.f32 1.442695, %v217_v7 }
  0xab   : > { %v216_v9 = vpop.xlane.xlu0 %215 }
  0xac   : > { %498 = vpow2.f32 %v219_v8  ;;  %v218_v10 = vsub.f32 %v207_v1, %v216_v9 }
  0xae   : > { %v221_v11 = vmul.f32 1.442695, %v218_v10 }
  0xb0   : > { %500 = vpow2.f32 %v221_v11 }
  0xb3   : > { %v243_v24 = vpop.permute.xlu0 %242 }
  0xb4   : > { %vm247_vm1 = vcmp.eq.s32.totalorder %v646_v22, %v243_v24 }
  0xb6   : > { %v499_v12 = vpop.eup %498 }
  0xb7   : > { %v223_v13 = vsel %vm210_vm0, %v499_v12, 0.0 }
  0xb8   : > { %224 = vadd.xlane.f32.xlu1 %v223_v13 }
  0xba   : > { %v501_v14 = vpop.eup %500 }
  0xbb   : > { %v226_v15 = vsel %vm210_vm0, %v501_v14, 0.0 }
  0xbc   : > { %227 = vadd.xlane.f32.xlu1 %v226_v15 }
  0xcd   : > { %245 = vperm.xlu1 %497, %v209_v16  }
 0x145   : > { %v225_v17 = vpop.xlane.xlu1 %224 }
 0x146   : > { %502 = vrcp.f32 %v225_v17 }
 0x149   : > { %v228_v18 = vpop.xlane.xlu1 %227 }
 0x14a   : > { %504 = vrcp.f32 %v228_v18 }
 0x14d   : > { %v246_v29 = vpop.permute.xlu1 %245 }
 0x14e   : > { %vm248_vm2 = vcmp.eq.s32.totalorder %v646_v22, %v246_v29 }
 0x150   : > { %v503_v20 = vpop.eup %502 }
 0x151   : > { %v231_v21 = vmul.f32 %v503_v20, %v225_v17 }
 0x153   : > { %v233_v23 = vsub.f32 2.0, %v231_v21 }
 0x154   : > { %v505_v25 = vpop.eup %504 }
 0x155   : > { %v235_v26 = vmul.f32 %v503_v20, %v233_v23  ;;  %v232_v27 = vmul.f32 %v505_v25, %v228_v18 }
 0x157   : > { %v234_v28 = vsub.f32 2.0, %v232_v27  ;;  %v237_v30 = vmul.f32 %v499_v12, %v235_v26 }
 0x159   : > { %v236_v31 = vmul.f32 %v505_v25, %v234_v28  ;;  %v249_v32 = vsel %vm247_vm1, %v237_v30, 0.0  ;;  %v257_v34 = vmul.f32 %v237_v30, %v237_v30  ;;  %v265_v41 = vmax.f32 %v237_v30, 1e-07 }
 0x15a   : > { %v251_v33 = vsel %vm210_vm0, %v249_v32, 0.0 }
 0x15b   : > { %252 = vadd.xlane.f32.xlu1 %v251_v33  ;;  %v238_v35 = vmul.f32 %v501_v14, %v236_v31  ;;  %v259_v38 = vsel %vm210_vm0, %v257_v34, 0.0  ;;  %v267_v42 = vsel %vm210_vm0, %v265_v41, 0.0 }
 0x15d   : > { %v250_v36 = vsel %vm248_vm2, %v238_v35, 0.0  ;;  %v258_v39 = vmul.f32 %v238_v35, %v238_v35  ;;  %v266_v43 = vmax.f32 %v238_v35, 1e-07 }
 0x15e   : > { %v254_v37 = vsel %vm210_vm0, %v250_v36, 0.0 }
 0x15f   : > { %255 = vadd.xlane.f32.xlu0 %v254_v37  ;;  %260 = vadd.xlane.f32.xlu1 %v259_v38  ;;  %v262_v40 = vsel %vm210_vm0, %v258_v39, 0.0  ;;  %v270_v44 = vsel %vm210_vm0, %v266_v43, 0.0 }
 0x163   : > { %263 = vadd.xlane.f32.xlu1 %v262_v40 }
 0x167   : > { %268 = vadd.xlane.f32.xlu1 %v267_v42 }
 0x16b   : > { %271 = vadd.xlane.f32.xlu1 %v270_v44 }
 0x1e8   : > { %v253_v48 = vpop.xlane.xlu1 %252 }
 0x1e9   : > { %v273_v50 = vsub.f32 1.0, %v253_v48  ;;  %v277_v53 = vmul.f32 2.0, %v253_v48  ;;  %v283_v5 = vmax.f32 %v253_v48, 1e-07 }
 0x1eb   : > { %v275_v52 = vmul.f32 2.0, %v273_v50 }
 0x1ec   : > { %v261_v54 = vpop.xlane.xlu1 %260  ;;  %v256_v55 = vpop.xlane.xlu0 %255 }
 0x1ed   : > { %v279_v56 = vsub.f32 %v261_v54, %v277_v53  ;;  %v274_v57 = vsub.f32 1.0, %v256_v55  ;;  %v278_v60 = vmul.f32 2.0, %v256_v55  ;;  %v296_v61 = vsel %vm294_vm3, %v275_v52, 0.0 }
 0x1ee   : > { %v299_v1 = vsel %vm298_vm5, %v296_v61, 0.0  ;;  %v284_v12 = vmax.f32 %v256_v55, 1e-07 }
 0x1ef   : > { %v281_v58 = vadd.f32 1.0, %v279_v56  ;;  %v276_v59 = vmul.f32 2.0, %v274_v57 }
 0x1f0   : > { %v264_v62 = vpop.xlane.xlu1 %263 }
 0x1f1   : > { %v280_v63 = vsub.f32 %v264_v62, %v278_v60  ;;  %v297_v0 = vsel %vm295_vm4, %v276_v59, 0.0  ;;  %v311_v3 = vsel %vm294_vm3, %v281_v58, 0.0 }
 0x1f2   : > { %v300_v2 = vsel %vm298_vm5, %v297_v0, 0.0  ;;  %v313_v10 = vsel %vm298_vm5, %v311_v3, 0.0 }
 0x1f3   : > { %v282_v4 = vadd.f32 1.0, %v280_v63  ;;  %v301_v6 = vadd.f32 %v300_v2, %v299_v1 }
 0x1f4   : > { %v269_v7 = vpop.xlane.xlu1 %268 }
 0x1f5   : > { %v312_v8 = vsel %vm295_vm4, %v282_v4, 0.0  ;;  %v285_v9 = vsub.f32 %v269_v7, %v283_v5  ;;  %302 = vadd.xlane.f32.xlu1 %v301_v6 }
 0x1f6   : > { %v314_v11 = vsel %vm298_vm5, %v312_v8, 0.0 }
 0x1f7   : > { %v315_v13 = vadd.f32 %v314_v11, %v313_v10  ;;  %v325_v15 = vsel %vm294_vm3, %v285_v9, 0.0 }
 0x1f8   : > { %v272_v14 = vpop.xlane.xlu1 %271  ;;  %v327_v18 = vsel %vm298_vm5, %v325_v15, 0.0 }
 0x1f9   : > { %v286_v16 = vsub.f32 %v272_v14, %v284_v12  ;;  %316 = vadd.xlane.f32.xlu1 %v315_v13 }
 0x1fb   : > { %v326_v17 = vsel %vm295_vm4, %v286_v16, 0.0 }
 0x1fc   : > { %v328_v19 = vsel %vm298_vm5, %v326_v17, 0.0 }
 0x1fd   : > { %v329_v20 = vadd.f32 %v328_v19, %v327_v18 }
 0x1ff   : > { %330 = vadd.xlane.f32.xlu0 %v329_v20 }
 0x282   : > { %v303_v21 = vpop.xlane.xlu1 %302 }
 0x283   : > { %v304_v23 = vrot.slane %v303_v21, 4 }
 0x285   : > { %v305_v24 = vadd.f32 %v304_v23, %v303_v21 }
 0x286   : > { %v317_v25 = vpop.xlane.xlu1 %316 }
 0x287   : > { %v306_v26 = vrot.slane %v305_v24, 2  ;;  %v318_v27 = vrot.slane %v317_v25, 4 }
 0x289   : > { %v319_v28 = vadd.f32 %v318_v27, %v317_v25  ;;  %v307_v29 = vadd.f32 %v306_v26, %v305_v24 }
 0x28b   : > { %v320_v30 = vrot.slane %v319_v28, 2  ;;  %v308_v31 = vrot.slane %v307_v29, 1 }
 0x28c   : > { %v331_v32 = vpop.xlane.xlu0 %330 }
 0x28d   : > { %v321_v33 = vadd.f32 %v320_v30, %v319_v28  ;;  %v332_v34 = vrot.slane %v331_v32, 4  ;;  %v309_v35 = vadd.f32 %v308_v31, %v307_v29 }
 0x28f   : > { %v333_v36 = vadd.f32 %v332_v34, %v331_v32  ;;  %450 = vpush %v309_v35  ;;  %v322_v37 = vrot.slane %v321_v33, 1 }
 0x291   : > { %v334_v38 = vrot.slane %v333_v36, 2  ;;  %v323_v39 = vadd.f32 %v322_v37, %v321_v33 }
 0x293   : > { %v335_v40 = vadd.f32 %v334_v38, %v333_v36  ;;  %452 = vpush %v323_v39 }
 0x295   : > { %v336_v41 = vrot.slane %v335_v40, 1 }
 0x297   : > { %v337_v42 = vadd.f32 %v336_v41, %v335_v40 }
 0x299   : > { %454 = vpush %v337_v42 }
 0x2c0   : > { %s451_s4 = spop %450 }
 0x2c1   : > { %v346_v47 = vstv %s451_s4 }
 0x2c4   : > { %s453_s5 = spop %452 }
 0x2c5   : > { %v344_v44 = vstv %s453_s5 }
 0x2ca   : > { %s455_s6 = spop %454 }
 0x2cb   : > { %v342_v43 = vstv %s455_s6 }
 0x2cc   : > { %v343_v46 = vsel %vm341_vm6, %v342_v43, 0.0 }
 0x2cd   : > { %v345_v48 = vsel %vm340_vm7, %v344_v44, %v343_v46 }
 0x2ce   : > { %v347_v49 = vsel %vm339_vm8, %v346_v47, %v345_v48 }
 0x2cf   : > { %v349_v22 = vsel %vm348_vm9, %v347_v49, 0.0 }
 0x2d0   : > { %350 = vst [vmem:[%s177_s8] sm:$0xff] %v349_v22 }
 0x2d1   : > { %519 = shalt.err (!%p516_p3)
}
 0x2d2   : > { %s520_s26 = scalar_lea.hbm %s682_s21, 128  ;;  %s524_s29 = scalar_lea.hbm %s726_s2, 512 }
 0x2d3   : > { %p521_p4 = scmp.ne.s32.totalorder %s682_s21, %s520_s26  ;;  %p525_p9 = scmp.lt.u32.totalorder %s682_s21, %s726_s2 }
 0x2d4   : > { %p526_p10 = scmp.lt.u32.totalorder %s524_s29, %s520_s26  ;;  %p528_p12 = scmp.lt.u32.totalorder %s520_s26, %s682_s21 }
 0x2d5   : > { %p522_p7 = pnand %p521_p4, %p625_p5 }
 0x2d6   : > { %p527_p11 = por %p526_p10, %p525_p9 }
 0x2d7   : > { %p523_p8 = pneg %p522_p7 }
 0x2d8   : > { %p529_p13 = por %p528_p12, %p527_p11 }
 0x2da   : > { %p530_p0 = pnand %p529_p13, %p523_p8 }
 0x2dc   : > { %533 = shalt.err (!%p530_p0)
}
 0x2dd   : > { %456 = dma.vmem_to_hbm [thread:$0]  (%p625_p5), %s684_s14, 128, %s682_s21, %s352_s13  }
 0x2de PF: > { %p462_p1 = scmp.ge.s32.totalorder %s568_s12, 2  ;;  %s377_s4 = sand.u32 1, %s556_s9  }
 0x2df   : > { %s378_s5 = scalar_lea.sflag [#allocation3], %s377_s4 }
 0x2e0   : > { %p459_p2 = pnand %p462_p1, %p629_p6 }
 0x2e2   : > { %551 = dma.done.wait (!%p459_p2), %s378_s5, 128  }
 0x2e3   : > { %553 = vsyncadd (!%p459_p2), %s378_s5, 4294967168  ;;  %p12_p3 = scmp.ge.s32.totalorder %s612_s15, 6   ;;  %s729_s9 = smov %s560_s10 }
 0x2e4   : > { %s730_s10 = smov %s564_s11  ;;  %s731_s11 = smov %s623_s18 }
 0x2e5   : > { %s732_s12 = smov %s612_s15  ;;  %14 = sbr.rel (!%p12_p3) target bundleno = 3 (0x3), region = 66 }
 0x2ec   :  { %383 = vsyncpa [#allocation3], 1 }
 0x2ed   :  { %385 = vsyncpa [#allocation3 + $0x1], 1 }

</bundles_post_ra>
